<compile_context>
chip_gen: v7x
topology: tpu7x:2x2x1
jax: 0.10.0
libtpu: 0.0.40
codegen_flags: <defaults>
</compile_context>

<pallas_src>
import functools

import jax
import jax.numpy as jnp
from jax import lax
from jax.experimental import pallas as pl
from jax.experimental.pallas import tpu as pltpu

CLIENT_NUM = 3
FEATURE_DIM = 256  # per-client feature dim (fixed by the PyTorch module)
OUT_DIM = 2


def _round_up(x, m):
    return (x + m - 1) // m * m


def _device_kind():
    try:
        return jax.devices()[0].device_kind.lower()
    except Exception:  # pragma: no cover - defensive (e.g. no backend yet)
        return ""


_KIND = _device_kind()
_IS_V5E = ("v5 lite" in _KIND) or ("v5lite" in _KIND) or ("v5e" in _KIND)
_IS_V7 = ("7x" in _KIND) or ("v7" in _KIND)
# Row-tile budget per generation (see header comment).
_ROW_TILE = 1024 if _IS_V5E else 2048


def _head_kernel(x_ref, w_ref, b_ref, o_ref):
    """One row tile, all clients.

    x_ref : (C, tm, D)    row tile for every client
    w_ref : (Cw, 2, D)    per-client (Cw=C, 'concat') or shared (Cw=1) W^T
    b_ref : (2, 1)        bias
    o_ref : (2, tm)       transposed output tile (lane-dense: tm on lanes)
    """
    n_clients = x_ref.shape[0]
    shared_w = w_ref.shape[0] == 1

    if shared_w:
        # 'sum' / 'mean': reduce clients on the VPU, then a single MXU push
        # (one stationary-weight load per tile instead of C).
        xs = x_ref[0]
        for c in range(1, n_clients):  # static unroll
            xs = xs + x_ref[c]
        acc = lax.dot_general(
            w_ref[0],
            xs,
            dimension_numbers=(((1,), (1,)), ((), ())),
            preferred_element_type=jnp.float32,
        )
    else:
        # 'concat': per-client weight slab, accumulate in registers.
        acc = jnp.zeros(o_ref.shape, jnp.float32)
        for c in range(n_clients):  # static unroll
            acc = acc + lax.dot_general(
                w_ref[c],
                x_ref[c],
                dimension_numbers=(((1,), (1,)), ((), ())),
                preferred_element_type=jnp.float32,
            )
    o_ref[...] = (acc + b_ref[...]).astype(o_ref.dtype)


@functools.partial(jax.jit, static_argnames=("aggregation",))
def global_model_forward(x_stack, weight, bias, *, aggregation="concat"):
    """x_stack: (C, B, T, D) stacked client features.
    weight:   (fusion_input_dim, 2)   == nn.Linear.weight.T
    bias:     (2,)
    """
    C, B, T, D = x_stack.shape
    M = B * T
    dtype = x_stack.dtype

    # Per-client (or shared) weight slabs, pre-transposed to (Cw, OUT_DIM, D).
    if aggregation == "concat":
        assert weight.shape[0] == C * D
        w_t = jnp.swapaxes(weight.reshape(C, D, OUT_DIM), 1, 2)   # (C, 2, D)
    elif aggregation == "sum":
        assert weight.shape[0] == D
        w_t = weight.T[None]                                      # (1, 2, D)
    elif aggregation == "mean":
        assert weight.shape[0] == D
        w_t = (weight / C).T[None]                                # fold 1/C into W (f32)
    else:
        raise ValueError(f"unknown aggregation: {aggregation}")
    w_t = w_t.astype(dtype)
    Cw = w_t.shape[0]
    b2 = bias.reshape(OUT_DIM, 1).astype(dtype)

    # Flatten rows.  No padding copy: the grid uses cdiv and Pallas masks the
    # partial last block on the output store; OOB input rows only affect
    # output lanes >= M, which are never written back.
    x2 = x_stack.reshape(C, M, D)

    # Row tile: multiple of 128 (lane-dense output), bounded by the per-gen
    # VMEM budget; on v7x also keep >= ~4 grid steps per TensorCore so both
    # cores stream from HBM.
    tm = min(_ROW_TILE, _round_up(M, 128))
    if _IS_V7:
        tm = min(tm, max(128, _round_up(pl.cdiv(M, 8), 128)))
    grid = (pl.cdiv(M, tm),)

    itemsize = jnp.dtype(dtype).itemsize
    cost = pl.CostEstimate(
        flops=2 * M * C * D * OUT_DIM,
        transcendentals=0,
        bytes_accessed=(C * M * D + Cw * OUT_DIM * D + OUT_DIM
                        + OUT_DIM * M) * itemsize,
    )

    out_t = pl.pallas_call(
        _head_kernel,
        out_shape=jax.ShapeDtypeStruct((OUT_DIM, M), dtype),
        grid_spec=pltpu.PrefetchScalarGridSpec(
            num_scalar_prefetch=0,
            grid=grid,
            in_specs=[
                pl.BlockSpec((C, tm, D), lambda i: (0, i, 0)),
                pl.BlockSpec((Cw, OUT_DIM, D), lambda i: (0, 0, 0)),
                pl.BlockSpec((OUT_DIM, 1), lambda i: (0, 0)),
            ],
            out_specs=pl.BlockSpec((OUT_DIM, tm), lambda i: (0, i)),
        ),
        compiler_params=pltpu.CompilerParams(
            dimension_semantics=("parallel",),  # row tiles are independent
        ),
        cost_estimate=cost,
    )(x2, w_t, b2)

    # (2, M) -> (M, 2) -> (B, T, 2)
    return out_t.T.reshape(B, T, OUT_DIM)


def _reference_forward(x_stack, weight, bias, aggregation):
    """Pure-JAX reference mirroring the PyTorch module."""
    if aggregation == "sum":
        t = jnp.sum(x_stack, axis=0)
    elif aggregation == "mean":
        t = jnp.mean(x_stack, axis=0)
    elif aggregation == "concat":
        t = jnp.concatenate(list(x_stack), axis=2)
    return t @ weight + bias


if __name__ == "__main__":
    key = jax.random.PRNGKey(0)
    B, T = 2, 8  # small batch / sequence, M = 16 rows (exercises partial tile)

    k_x, k_wc, k_ws, k_b = jax.random.split(key, 4)

    # Stacked client features: (C, B, T, 256)
    x_stack = jax.random.normal(
        k_x, (CLIENT_NUM, B, T, FEATURE_DIM), dtype=jnp.float32
    )

    # Deterministic "nn.Linear" params (stored as (in, out) = weight.T).
    w_concat = (
        jax.random.normal(k_wc, (FEATURE_DIM * CLIENT_NUM, OUT_DIM), jnp.float32)
        * 0.02
    )
    w_shared = jax.random.normal(k_ws, (FEATURE_DIM, OUT_DIM), jnp.float32) * 0.02
    b = jax.random.normal(k_b, (OUT_DIM,), jnp.float32) * 0.02

    ok = True
    for mode, w in (("concat", w_concat), ("sum", w_shared), ("mean", w_shared)):
        out = global_model_forward(x_stack, w, b, aggregation=mode)
        out = jax.block_until_ready(out)
        ref = _reference_forward(x_stack, w, b, mode)
        if out.shape != ref.shape or not jnp.allclose(out, ref, atol=1e-4, rtol=1e-4):
            ok = False
            print(f"MISMATCH in mode {mode}")

    if ok:
        print("KERNEL_OK")
</pallas_src>

<mosaic_0001>
module attributes {stable_mosaic.version = 11 : i64} {
  func.func @_head_kernel(%arg0: i32, %arg1: memref<3x128x256xf32, #tpu.memory_space<vmem>>, %arg2: memref<3x2x256xf32, #tpu.memory_space<vmem>>, %arg3: memref<2x1xf32, #tpu.memory_space<vmem>>, %arg4: memref<2x128xf32, #tpu.memory_space<vmem>>) attributes {dimension_semantics = [#tpu.dimension_semantics<parallel>], iteration_bounds = array<i64: 1>, scalar_prefetch = 0 : i64, scratch_operands = 0 : i64, tpu.core_type = #tpu.core_type<tc>, window_params = [{transform_indices = @transform_0, window_bounds = array<i64: 3, 128, 256>}, {pipeline_mode = #tpu.pipeline_mode<synchronous>, transform_indices = @transform_1, window_bounds = array<i64: 3, 2, 256>}, {pipeline_mode = #tpu.pipeline_mode<synchronous>, transform_indices = @transform_2, window_bounds = array<i64: 2, 1>}, {transform_indices = @transform_3, window_bounds = array<i64: 2, 128>}]} {
    %cst = arith.constant 0.000000e+00 : f32
    %0 = vector.broadcast %cst : f32 to vector<2x128xf32>
    %c0 = arith.constant 0 : index
    %c0_0 = arith.constant 0 : index
    %c0_1 = arith.constant 0 : index
    %1 = vector.load %arg2[%c0, %c0_0, %c0_1] : memref<3x2x256xf32, #tpu.memory_space<vmem>>, vector<1x2x256xf32>
    %2 = vector.shape_cast %1 : vector<1x2x256xf32> to vector<2x256xf32>
    %c0_2 = arith.constant 0 : index
    %c0_3 = arith.constant 0 : index
    %c0_4 = arith.constant 0 : index
    %3 = vector.load %arg1[%c0_2, %c0_3, %c0_4] : memref<3x128x256xf32, #tpu.memory_space<vmem>>, vector<1x128x256xf32>
    %4 = vector.shape_cast %3 : vector<1x128x256xf32> to vector<128x256xf32>
    %cst_5 = arith.constant dense<0.000000e+00> : vector<2x128xf32>
    %5 = tpu.matmul %2, %4, %cst_5 {dimension_numbers = #tpu.dot_dimension_numbers<[1], [1], [0], [0], [0, 0, 1, 0], [], []>} : vector<2x256xf32>, vector<128x256xf32>, vector<2x128xf32> -> vector<2x128xf32>
    %6 = arith.addf %0, %5 : vector<2x128xf32>
    %c1 = arith.constant 1 : index
    %c0_6 = arith.constant 0 : index
    %c0_7 = arith.constant 0 : index
    %7 = vector.load %arg2[%c1, %c0_6, %c0_7] : memref<3x2x256xf32, #tpu.memory_space<vmem>>, vector<1x2x256xf32>
    %8 = vector.shape_cast %7 : vector<1x2x256xf32> to vector<2x256xf32>
    %c1_8 = arith.constant 1 : index
    %c0_9 = arith.constant 0 : index
    %c0_10 = arith.constant 0 : index
    %9 = vector.load %arg1[%c1_8, %c0_9, %c0_10] : memref<3x128x256xf32, #tpu.memory_space<vmem>>, vector<1x128x256xf32>
    %10 = vector.shape_cast %9 : vector<1x128x256xf32> to vector<128x256xf32>
    %cst_11 = arith.constant dense<0.000000e+00> : vector<2x128xf32>
    %11 = tpu.matmul %8, %10, %cst_11 {dimension_numbers = #tpu.dot_dimension_numbers<[1], [1], [0], [0], [0, 0, 1, 0], [], []>} : vector<2x256xf32>, vector<128x256xf32>, vector<2x128xf32> -> vector<2x128xf32>
    %12 = arith.addf %6, %11 : vector<2x128xf32>
    %c2 = arith.constant 2 : index
    %c0_12 = arith.constant 0 : index
    %c0_13 = arith.constant 0 : index
    %13 = vector.load %arg2[%c2, %c0_12, %c0_13] : memref<3x2x256xf32, #tpu.memory_space<vmem>>, vector<1x2x256xf32>
    %14 = vector.shape_cast %13 : vector<1x2x256xf32> to vector<2x256xf32>
    %c2_14 = arith.constant 2 : index
    %c0_15 = arith.constant 0 : index
    %c0_16 = arith.constant 0 : index
    %15 = vector.load %arg1[%c2_14, %c0_15, %c0_16] : memref<3x128x256xf32, #tpu.memory_space<vmem>>, vector<1x128x256xf32>
    %16 = vector.shape_cast %15 : vector<1x128x256xf32> to vector<128x256xf32>
    %cst_17 = arith.constant dense<0.000000e+00> : vector<2x128xf32>
    %17 = tpu.matmul %14, %16, %cst_17 {dimension_numbers = #tpu.dot_dimension_numbers<[1], [1], [0], [0], [0, 0, 1, 0], [], []>} : vector<2x256xf32>, vector<128x256xf32>, vector<2x128xf32> -> vector<2x128xf32>
    %18 = arith.addf %12, %17 : vector<2x128xf32>
    %c0_18 = arith.constant 0 : index
    %c0_19 = arith.constant 0 : index
    %19 = vector.load %arg3[%c0_18, %c0_19] : memref<2x1xf32, #tpu.memory_space<vmem>>, vector<2x1xf32>
    %20 = vector.broadcast %19 : vector<2x1xf32> to vector<2x128xf32>
    %21 = arith.addf %18, %20 : vector<2x128xf32>
    %c0_20 = arith.constant 0 : index
    %c0_21 = arith.constant 0 : index
    %22 = vector.load %arg4[%c0_20, %c0_21] : memref<2x128xf32, #tpu.memory_space<vmem>>, vector<2x128xf32>
    tpu.vector_store %arg4[%c0_20, %c0_21], %21 {strides = array<i32>} : memref<2x128xf32, #tpu.memory_space<vmem>>, vector<2x128xf32>,
    return
  }
  func.func @transform_0(%arg0: i32) -> (i32, i32, i32) {
    %c0_i32 = arith.constant 0 : i32
    %c0_i32_0 = arith.constant 0 : i32
    %c0_i32_1 = arith.constant 0 : i32
    return %c0_i32, %arg0, %c0_i32_0 : i32, i32, i32
  }
  func.func @transform_1(%arg0: i32) -> (i32, i32, i32) {
    %c0_i32 = arith.constant 0 : i32
    %c0_i32_0 = arith.constant 0 : i32
    %c0_i32_1 = arith.constant 0 : i32
    %c0_i32_2 = arith.constant 0 : i32
    return %c0_i32, %c0_i32_0, %c0_i32_1 : i32, i32, i32
  }
  func.func @transform_2(%arg0: i32) -> (i32, i32) {
    %c0_i32 = arith.constant 0 : i32
    %c0_i32_0 = arith.constant 0 : i32
    %c0_i32_1 = arith.constant 0 : i32
    return %c0_i32, %c0_i32_0 : i32, i32
  }
  func.func @transform_3(%arg0: i32) -> (i32, i32) {
    %c0_i32 = arith.constant 0 : i32
    %c0_i32_0 = arith.constant 0 : i32
    return %c0_i32, %arg0 : i32, i32
  }
}

</mosaic_0001>

<bundles_post_ra>
// kernel: global_model_forward.1
= control target key start
LH: loop header
LB: loop body
LE: loop exit
PB: predicated region body
PF: predicated region fallthrough
CT: control target
= control target key end

     0   :  { %8 = vsyncpa [#allocation3], 0  ;;  %s585_s0 = inlined_call_operand.hbm [shape: f32[3,16,256], index: 0, kind: input, shape index: {}]   ;;  %s586_s1 = inlined_call_operand.vmem [shape: f32[3,2,256], index: 1, kind: input, shape index: {}]   ;;  %s587_s2 = inlined_call_operand.vmem [shape: f32[2,1], index: 2, kind: input, shape index: {}]   ;;  %s588_s3 = inlined_call_operand.vmem [shape: f32[2,16], index: 3, kind: output, shape index: {}]  }
   0x1   :  { %13 = vsyncadd [#allocation3], 10752  ;;  %s18_s12 = sld [smem:[#allocation0]]   ;;  %s528_s13 = smov [#allocation2]  }
   0x2   :  { %s26_s14 = sshll.u32 %s528_s13, 4  ;;  %s529_s15 = smov 512   ;;  %s27_s14 = int_to_ptr.vmem [resolvable:$true] %s26_s14 }
   0x3   :  { %33 = sst [smem:[#allocation5]] %s529_s15  ;;  %s530_s16 = smov 4096  }
   0x4   :  { %35 = sst [smem:[#allocation5 + $0x1]] %s530_s16  ;;  %s531_s17 = smov 2  }
   0x5   :  { %37 = sst [smem:[#allocation5 + $0x2]] %s531_s17  ;;  %s532_s19 = smov 256  }
   0x6   :  { %39 = sst [smem:[#allocation5 + $0x3]] %s532_s19  ;;  %s533_s21 = smov 16  }
   0x7   :  { %s413_s18 = sshll.u32 %s18_s12, 26  ;;  %41 = sst [smem:[#allocation5 + $0x4]] %s532_s19 }
   0x8   :  { %s414_s20 = sadd.s32 134217728, %s413_s18  ;;  %43 = sst [smem:[#allocation5 + $0x5]] %s533_s21 }
   0x9   :  { %s534_s22 = smov [#allocation3]   ;;  %s535_s23 = smov [#allocation4]  }
   0xa   :  { %45 = dma.general %s585_s0, 1536, %s27_s14, %s534_s22, %s535_s23, [#allocation5], %s414_s20, 0  }
   0xb   :  { %526 = dma.done.wait [#allocation3], 12288  }
   0xc   :  { %527 = vsyncadd [#allocation3], 4294955008  ;;  %v90_v0 = vld [vmem:[#allocation2 + $0x108] sm:$0xff]  ;;  %v92_v1 = vld [vmem:[#allocation2 + $0x118] sm:$0xff]  ;;  %v536_v21 = vmov 0  }
   0xd   :  { %v89_v2 = vld [vmem:[#allocation2 + $0x100] sm:$0xff]  ;;  %v420_v3 = vpack.c.bf16 %v92_v1, %v90_v0  ;;  %v91_v4 = vld [vmem:[#allocation2 + $0x110] sm:$0xff]  ;;  %v55_v5 = vld [vmem:[#allocation2 + $0x8] sm:$0xff]  ;;  %525 = vset.pattern.permute.xlu0 %v536_v21 }
   0xe   :  { %v57_v6 = vld [vmem:[#allocation2 + $0x18] sm:$0xff]  ;;  %v422_v7 = vpack.c.bf16 %v91_v4, %v89_v2  ;;  %v54_v9 = vld [vmem:[#allocation2] sm:$0xff]  ;;  %v56_v10 = vld [vmem:[#allocation2 + $0x10] sm:$0xff] }
   0xf   :  { %v452_v8 = vpack.c.bf16 %v57_v6, %v55_v5  ;;  %v94_v11 = vld [vmem:[#allocation2 + $0x128] sm:$0xff]  ;;  %421 = vmatprep.subr.bf16.mxu0 %v420_v3  ;;  %v454_v12 = vpack.c.bf16 %v56_v10, %v54_v9  ;;  %v96_v13 = vld [vmem:[#allocation2 + $0x138] sm:$0xff]  ;;  %v93_v17 = vld [vmem:[#allocation2 + $0x120] sm:$0xff] }
  0x10   :  { %423 = vmatpush1.bf16.xpose.msra.mxu0 %v422_v7  ;;  %v424_v14 = vpack.c.bf16 %v96_v13, %v94_v11  ;;  %v59_v15 = vld [vmem:[#allocation2 + $0x28] sm:$0xff]  ;;  %v61_v16 = vld [vmem:[#allocation2 + $0x38] sm:$0xff]  ;;  %v95_v18 = vld [vmem:[#allocation2 + $0x130] sm:$0xff] }
  0x11   :  { %453 = vmatprep.subr.bf16.mxu1 %v452_v8  ;;  %v456_v19 = vpack.c.bf16 %v61_v16, %v59_v15  ;;  %v58_v20 = vld [vmem:[#allocation2 + $0x20] sm:$0xff]  ;;  %v60_v22 = vld [vmem:[#allocation2 + $0x30] sm:$0xff]  ;;  %v98_v23 = vld [vmem:[#allocation2 + $0x148] sm:$0xff]  ;;  %v426_v27 = vpack.c.bf16 %v95_v18, %v93_v17 }
  0x12   :  { %455 = vmatpush1.bf16.xpose.msra.mxu1 %v454_v12  ;;  %425 = vmatprep.subr.bf16.mxu0 %v424_v14  ;;  %v100_v24 = vld [vmem:[#allocation2 + $0x158] sm:$0xff]  ;;  %v63_v25 = vld [vmem:[#allocation2 + $0x48] sm:$0xff]  ;;  %v458_v28 = vpack.c.bf16 %v60_v22, %v58_v20  ;;  %v97_v31 = vld [vmem:[#allocation2 + $0x140] sm:$0xff] }
  0x13   :  { %457 = vmatprep.subr.bf16.mxu1 %v456_v19  ;;  %v65_v26 = vld [vmem:[#allocation2 + $0x58] sm:$0xff]  ;;  %v428_v29 = vpack.c.bf16 %v100_v24, %v98_v23  ;;  %v99_v32 = vld [vmem:[#allocation2 + $0x150] sm:$0xff]  ;;  %v62_v33 = vld [vmem:[#allocation2 + $0x40] sm:$0xff] }
  0x14   :  { %v460_v30 = vpack.c.bf16 %v65_v26, %v63_v25  ;;  %v64_v34 = vld [vmem:[#allocation2 + $0x50] sm:$0xff]  ;;  %v102_v35 = vld [vmem:[#allocation2 + $0x168] sm:$0xff]  ;;  %v104_v36 = vld [vmem:[#allocation2 + $0x178] sm:$0xff]  ;;  %v430_v39 = vpack.c.bf16 %v99_v32, %v97_v31 }
  0x15   :  { %v67_v37 = vld [vmem:[#allocation2 + $0x68] sm:$0xff]  ;;  %v69_v38 = vld [vmem:[#allocation2 + $0x78] sm:$0xff]  ;;  %v462_v40 = vpack.c.bf16 %v64_v34, %v62_v33  ;;  %v432_v41 = vpack.c.bf16 %v104_v36, %v102_v35  ;;  %v101_v43 = vld [vmem:[#allocation2 + $0x160] sm:$0xff] }
  0x16   :  { %v464_v42 = vpack.c.bf16 %v69_v38, %v67_v37  ;;  %v103_v44 = vld [vmem:[#allocation2 + $0x170] sm:$0xff]  ;;  %v66_v45 = vld [vmem:[#allocation2 + $0x60] sm:$0xff]  ;;  %v106_v48 = vld [vmem:[#allocation2 + $0x188] sm:$0xff] }
  0x17   :  { %v68_v46 = vld [vmem:[#allocation2 + $0x70] sm:$0xff]  ;;  %v563_v47 = vld.sshfl [vmem:[%s586_s1 + $0x4] sm:$0x33 pattern:$0x76325410]  ;;  %v108_v49 = vld [vmem:[#allocation2 + $0x198] sm:$0xff]  ;;  %v434_v55 = vpack.c.bf16 %v103_v44, %v101_v43 }
  0x18   :  { %427 = vmatpush1.bf16.xpose.msra.mxu0 %v426_v27  ;;  %v129_v50 = vcombine.high %v563_v47, %v563_v47  ;;  %v570_v51 = vld.sshfl [vmem:[%s586_s1] sm:$0x33 pattern:$0x76325410]  ;;  %v71_v52 = vld [vmem:[#allocation2 + $0x88] sm:$0xff]  ;;  %v73_v53 = vld [vmem:[#allocation2 + $0x98] sm:$0xff]  ;;  %v466_v56 = vpack.c.bf16 %v68_v46, %v66_v45  ;;  %v436_v57 = vpack.c.bf16 %v108_v49, %v106_v48 }
  0x19   :  { %429 = vmatprep.subr.bf16.mxu0 %v428_v29  ;;  %v210_v54 = vcombine.high %v570_v51, %v570_v51  ;;  %v468_v58 = vpack.c.bf16 %v73_v53, %v71_v52  ;;  %v105_v59 = vld [vmem:[#allocation2 + $0x180] sm:$0xff]  ;;  %v107_v60 = vld [vmem:[#allocation2 + $0x190] sm:$0xff]  ;;  %v110_v63 = vld [vmem:[#allocation2 + $0x1a8] sm:$0xff] }
  0x1a   :  { %459 = vmatpush1.bf16.xpose.msra.mxu1 %v458_v28  ;;  %196 = vmatprep.mubr.f32.mxu0 %v129_v50  ;;  %v70_v61 = vld [vmem:[#allocation2 + $0x80] sm:$0xff]  ;;  %v72_v62 = vld [vmem:[#allocation2 + $0x90] sm:$0xff]  ;;  %v112_v0 = vld [vmem:[#allocation2 + $0x1b8] sm:$0xff]  ;;  %v438_v3 = vpack.c.bf16 %v107_v60, %v105_v59 }
  0x1b   :  { %461 = vmatprep.subr.bf16.mxu1 %v460_v30  ;;  %277 = vmatprep.mubr.f32.mxu1 %v210_v54  ;;  %v75_v1 = vld [vmem:[#allocation2 + $0xa8] sm:$0xff]  ;;  %v77_v2 = vld [vmem:[#allocation2 + $0xb8] sm:$0xff]  ;;  %v470_v4 = vpack.c.bf16 %v72_v62, %v70_v61  ;;  %v440_v5 = vpack.c.bf16 %v112_v0, %v110_v63  ;;  %v400_v6 = vld [vmem:[%s587_s2] sm:$0x3] }
  0x1c   :  { %v472_v7 = vpack.c.bf16 %v77_v2, %v75_v1  ;;  %403 = vperm.xlu0 %525, %v400_v6   ;;  %v109_v8 = vld [vmem:[#allocation2 + $0x1a0] sm:$0xff]  ;;  %v111_v9 = vld [vmem:[#allocation2 + $0x1b0] sm:$0xff]  ;;  %v114_v12 = vld [vmem:[#allocation2 + $0x1c8] sm:$0xff] }
  0x1d   :  { %v74_v10 = vld [vmem:[#allocation2 + $0xa0] sm:$0xff]  ;;  %v76_v11 = vld [vmem:[#allocation2 + $0xb0] sm:$0xff]  ;;  %v116_v13 = vld [vmem:[#allocation2 + $0x1d8] sm:$0xff]  ;;  %v442_v16 = vpack.c.bf16 %v111_v9, %v109_v8 }
  0x1e   :  { %v79_v14 = vld [vmem:[#allocation2 + $0xc8] sm:$0xff]  ;;  %v81_v15 = vld [vmem:[#allocation2 + $0xd8] sm:$0xff]  ;;  %v474_v17 = vpack.c.bf16 %v76_v11, %v74_v10  ;;  %v444_v18 = vpack.c.bf16 %v116_v13, %v114_v12  ;;  %v113_v20 = vld [vmem:[#allocation2 + $0x1c0] sm:$0xff] }
  0x1f   :  { %v476_v19 = vpack.c.bf16 %v81_v15, %v79_v14  ;;  %v115_v21 = vld [vmem:[#allocation2 + $0x1d0] sm:$0xff]  ;;  %v78_v22 = vld [vmem:[#allocation2 + $0xc0] sm:$0xff]  ;;  %v118_v24 = vld [vmem:[#allocation2 + $0x1e8] sm:$0xff] }
  0x20   :  { %431 = vmatpush1.bf16.xpose.msra.mxu0 %v430_v39  ;;  %v80_v23 = vld [vmem:[#allocation2 + $0xd0] sm:$0xff]  ;;  %v120_v25 = vld [vmem:[#allocation2 + $0x1f8] sm:$0xff]  ;;  %v83_v26 = vld [vmem:[#allocation2 + $0xe8] sm:$0xff]  ;;  %v446_v28 = vpack.c.bf16 %v115_v21, %v113_v20 }
  0x21   :  { %433 = vmatprep.subr.bf16.mxu0 %v432_v41  ;;  %v85_v27 = vld [vmem:[#allocation2 + $0xf8] sm:$0xff]  ;;  %v478_v29 = vpack.c.bf16 %v80_v23, %v78_v22  ;;  %v448_v30 = vpack.c.bf16 %v120_v25, %v118_v24  ;;  %v117_v32 = vld [vmem:[#allocation2 + $0x1e0] sm:$0xff]  ;;  %v119_v33 = vld [vmem:[#allocation2 + $0x1f0] sm:$0xff] }
  0x22   :  { %463 = vmatpush1.bf16.xpose.msra.mxu1 %v462_v40  ;;  %v480_v31 = vpack.c.bf16 %v85_v27, %v83_v26  ;;  %v82_v34 = vld [vmem:[#allocation2 + $0xe0] sm:$0xff]  ;;  %v84_v35 = vld [vmem:[#allocation2 + $0xf0] sm:$0xff]  ;;  %v287_v36 = vld [vmem:[#allocation2 + $0x208] sm:$0xff]  ;;  %v450_v38 = vpack.c.bf16 %v119_v33, %v117_v32 }
  0x23   :  { %465 = vmatprep.subr.bf16.mxu1 %v464_v42  ;;  %v289_v37 = vld [vmem:[#allocation2 + $0x218] sm:$0xff]  ;;  %v482_v39 = vpack.c.bf16 %v84_v35, %v82_v34  ;;  %v286_v41 = vld [vmem:[#allocation2 + $0x200] sm:$0xff]  ;;  %v288_v42 = vld [vmem:[#allocation2 + $0x210] sm:$0xff] }
  0x24   :  { %v484_v40 = vpack.c.bf16 %v289_v37, %v287_v36  ;;  %v291_v43 = vld [vmem:[#allocation2 + $0x228] sm:$0xff]  ;;  %v293_v44 = vld [vmem:[#allocation2 + $0x238] sm:$0xff]  ;;  %v486_v46 = vpack.c.bf16 %v288_v42, %v286_v41  ;;  %v290_v50 = vld [vmem:[#allocation2 + $0x220] sm:$0xff] }
  0x25   :  { %v419_v45 = vld.sshfl [vmem:[%s586_s1 + $0x8] sm:$0x33 pattern:$0x76325410]  ;;  %v488_v48 = vpack.c.bf16 %v293_v44, %v291_v43  ;;  %v292_v52 = vld [vmem:[#allocation2 + $0x230] sm:$0xff]  ;;  %v297_v54 = vld [vmem:[#allocation2 + $0x258] sm:$0xff] }
  0x26   :  { %v326_v49 = vcombine.high %v419_v45, %v419_v45  ;;  %v295_v53 = vld [vmem:[#allocation2 + $0x248] sm:$0xff]  ;;  %v301_v60 = vld [vmem:[#allocation2 + $0x278] sm:$0xff]  ;;  %v306_v9 = vld [vmem:[#allocation2 + $0x2a0] sm:$0xff] }
  0x27   :  { %v299_v59 = vld [vmem:[#allocation2 + $0x268] sm:$0xff]  ;;  %v305_v0 = vld [vmem:[#allocation2 + $0x298] sm:$0xff]  ;;  %v308_v10 = vld [vmem:[#allocation2 + $0x2b0] sm:$0xff] }
  0x28   :  { %435 = vmatpush1.bf16.xpose.msra.mxu0 %v434_v55  ;;  %v490_v55 = vpack.c.bf16 %v292_v52, %v290_v50  ;;  %v496_v62 = vpack.c.bf16 %v301_v60, %v299_v59  ;;  %v303_v63 = vld [vmem:[#allocation2 + $0x288] sm:$0xff]  ;;  %v309_v6 = vld [vmem:[#allocation2 + $0x2b8] sm:$0xff]  ;;  %v506_v13 = vpack.c.bf16 %v308_v10, %v306_v9  ;;  %v310_v15 = vld [vmem:[#allocation2 + $0x2c0] sm:$0xff] }
  0x29   :  { %437 = vmatprep.subr.bf16.mxu0 %v436_v57  ;;  %v294_v57 = vld [vmem:[#allocation2 + $0x240] sm:$0xff]  ;;  %v500_v2 = vpack.c.bf16 %v305_v0, %v303_v63  ;;  %v311_v11 = vld [vmem:[#allocation2 + $0x2c8] sm:$0xff]  ;;  %v313_v12 = vld [vmem:[#allocation2 + $0x2d8] sm:$0xff] }
  0x2a   :  { %467 = vmatpush1.bf16.xpose.msra.mxu1 %v466_v56  ;;  %v492_v56 = vpack.c.bf16 %v297_v54, %v295_v53  ;;  %v508_v14 = vpack.c.bf16 %v313_v12, %v311_v11  ;;  %v314_v21 = vld [vmem:[#allocation2 + $0x2e0] sm:$0xff]  ;;  %v316_v22 = vld [vmem:[#allocation2 + $0x2f0] sm:$0xff] }
  0x2b   :  { %469 = vmatprep.subr.bf16.mxu1 %v468_v58  ;;  %v296_v58 = vld [vmem:[#allocation2 + $0x250] sm:$0xff]  ;;  %v514_v23 = vpack.c.bf16 %v316_v22, %v314_v21 }
  0x2c   :  { %v494_v61 = vpack.c.bf16 %v296_v58, %v294_v57 }
  0x30   :  { %439 = vmatpush1.bf16.xpose.msra.mxu0 %v438_v3  ;;  %v302_v3 = vld [vmem:[#allocation2 + $0x280] sm:$0xff] }
  0x31   :  { %441 = vmatprep.subr.bf16.mxu0 %v440_v5  ;;  %v307_v5 = vld [vmem:[#allocation2 + $0x2a8] sm:$0xff] }
  0x32   :  { %471 = vmatpush1.bf16.xpose.msra.mxu1 %v470_v4  ;;  %v304_v4 = vld [vmem:[#allocation2 + $0x290] sm:$0xff]  ;;  %v504_v8 = vpack.c.bf16 %v309_v6, %v307_v5 }
  0x33   :  { %473 = vmatprep.subr.bf16.mxu1 %v472_v7  ;;  %v502_v7 = vpack.c.bf16 %v304_v4, %v302_v3 }
  0x38   :  { %443 = vmatpush1.bf16.xpose.msra.mxu0 %v442_v16  ;;  %v312_v16 = vld [vmem:[#allocation2 + $0x2d0] sm:$0xff] }
  0x39   :  { %445 = vmatprep.subr.bf16.mxu0 %v444_v18  ;;  %v317_v18 = vld [vmem:[#allocation2 + $0x2f8] sm:$0xff] }
  0x3a   :  { %475 = vmatpush1.bf16.xpose.msra.mxu1 %v474_v17  ;;  %v315_v17 = vld [vmem:[#allocation2 + $0x2e8] sm:$0xff] }
  0x3b   :  { %477 = vmatprep.subr.bf16.mxu1 %v476_v19  ;;  %v510_v19 = vpack.c.bf16 %v312_v16, %v310_v15  ;;  %v512_v20 = vpack.c.bf16 %v317_v18, %v315_v17 }
  0x40   :  { %447 = vmatpush1.bf16.xpose.msra.mxu0 %v446_v28 }
  0x41   :  { %449 = vmatprep.subr.bf16.mxu0 %v448_v30 }
  0x42   :  { %479 = vmatpush1.bf16.xpose.msra.mxu1 %v478_v29 }
  0x43   :  { %481 = vmatprep.subr.bf16.mxu1 %v480_v31 }
  0x48   :  { %451 = vmatpush1.bf16.xpose.msra.mxu0 %v450_v38 }
  0x49   :  { %485 = vmatprep.subr.bf16.mxu0 %v484_v40 }
  0x4a   :  { %483 = vmatpush1.bf16.xpose.msra.mxu1 %v482_v39 }
  0x4f   :  { %197 = vmatmul.mubr.f32.vlgmr.msra.gmra.mrb[0].mxu0 %v563_v47  ;;  %v298_v47 = vld [vmem:[#allocation2 + $0x260] sm:$0xff] }
  0x50   :  { %487 = vmatpush1.bf16.xpose.msra.mxu0 %v486_v46  ;;  %393 = vmatprep.mubr.f32.mxu0 %v326_v49 }
  0x51   :  { %278 = vmatmul.mubr.f32.vlgmr.msra.gmra.mrb[0].mxu1 %v570_v51  ;;  %489 = vmatprep.subr.bf16.mxu0 %v488_v48  ;;  %v300_v51 = vld [vmem:[#allocation2 + $0x270] sm:$0xff] }
  0x52   :  { %v498_v1 = vpack.c.bf16 %v300_v51, %v298_v47 }
  0x58   :  { %491 = vmatpush1.bf16.xpose.msra.mxu0 %v490_v55 }
  0x59   :  { %493 = vmatprep.subr.bf16.mxu0 %v492_v56 }
  0x60   :  { %495 = vmatpush1.bf16.xpose.msra.mxu0 %v494_v61 }
  0x61   :  { %497 = vmatprep.subr.bf16.mxu0 %v496_v62 }
  0x68   :  { %499 = vmatpush1.bf16.xpose.msra.mxu0 %v498_v1 }
  0x69   :  { %501 = vmatprep.subr.bf16.mxu0 %v500_v2 }
  0x70   :  { %503 = vmatpush1.bf16.xpose.msra.mxu0 %v502_v7 }
  0x71   :  { %505 = vmatprep.subr.bf16.mxu0 %v504_v8 }
  0x78   :  { %507 = vmatpush1.bf16.xpose.msra.mxu0 %v506_v13 }
  0x79   :  { %509 = vmatprep.subr.bf16.mxu0 %v508_v14 }
  0x80   :  { %511 = vmatpush1.bf16.xpose.msra.mxu0 %v510_v19 }
  0x81   :  { %513 = vmatprep.subr.bf16.mxu0 %v512_v20 }
  0x88   :  { %515 = vmatpush1.bf16.xpose.msra.mxu0 %v514_v23 }
  0x8f   :  { %394 = vmatmul.mubr.f32.vlgmr.msra.gmra.mrb[2].mxu0 %v419_v45 }
  0x9b   :  { %v404_v30 = vpop.permute.xlu0 %403 }
 0x122   :  { %v198_v24 = vpop.f32.mrb[0].mxu0 }
 0x123   :  { %v200_v25 = vpop.f32.mrb[1].mxu0 }
 0x124   :  { %v279_v26 = vpop.f32.mrb[0].mxu1 }
 0x125   :  { %v280_v27 = vadd.f32 %v279_v26, %v198_v24  ;;  %v281_v28 = vpop.f32.mrb[1].mxu1 }
 0x162   :  { %v395_v29 = vpop.f32.mrb[2].mxu0 }
 0x163   :  { %v399_v31 = vadd.f32 %v395_v29, %v280_v27  ;;  %v397_v32 = vpop.f32.mrb[3].mxu0 }
 0x165   :  { %v406_v33 = vadd.f32 %v404_v30, %v399_v31 }
 0x167   :  { %407 = vst [vmem:[%s588_s3] sm:$0x3] %v406_v33 }
 0x168   :  { %412 = vsyncpa [#allocation3], 1 }

</bundles_post_ra>
